<compile_context>
chip_gen: v7x
topology: tpu7x:2x2x1
jax: 0.10.0
libtpu: 0.0.40
codegen_flags: <defaults>
</compile_context>

<pallas_src>
import math
import functools

import jax
import jax.numpy as jnp
from jax import lax
from jax.experimental import pallas as pl
from jax.experimental.pallas import tpu as pltpu


# --------------------------------- helpers ---------------------------------

def _pick_tile(dim, cap, unit):
    """Largest tile <= cap that divides dim (multiples of `unit`); full dim if it already fits."""
    if dim <= cap:
        return dim
    t = (cap // unit) * unit
    while t >= unit:
        if dim % t == 0:
            return t
        t -= unit
    # TODO(synk): masked edge tiles for non-divisible shapes; fall back to untiled.
    return dim


# ----------------------- one-time weight preparation -----------------------

def prepare_params(params, head_num, *, param_dtype=jnp.float32, lane=128):
    """Hoisted out of the per-call path (run once at init):
       - fold 1/sqrt(d_v) into the Q projection,
       - zero-pad per-head d_v to a multiple of 128 (lane-dense attention, exact results),
       - fuse K/V, pre-transpose weights to (Din, Dout), pre-shape biases to (1, Dout),
       - optionally store weights in bf16 (biases kept f32 for an exact epilogue add)."""
    wq, bq = params["wq"], params["bq"]          # (D, D), (D,)
    wk, bk = params["wk"], params["bk"]          # (d_v, D), (d_v,)
    wv, bv = params["wv"], params["bv"]          # (d_v, D), (d_v,)
    wo, bo = params["wo"], params["bo"]          # (D, D), (D,)

    D = wq.shape[1]
    d_v = wk.shape[0]
    H = head_num
    assert D == H * d_v, "d_model must be an integer multiple of head_num"
    d_vp = ((d_v + lane - 1) // lane) * lane
    pad = d_vp - d_v
    scale = 1.0 / math.sqrt(d_v)                 # uses the *real* d_v

    # Q projection: scale folded in; zero rows appended per head so each head owns d_vp columns.
    wq_s = (wq * scale).reshape(H, d_v, D)
    bq_s = (bq * scale).reshape(H, d_v)
    wq_p = jnp.pad(wq_s, ((0, 0), (0, pad), (0, 0))).reshape(H * d_vp, D)
    bq_p = jnp.pad(bq_s, ((0, 0), (0, pad))).reshape(H * d_vp)

    # Fused K|V projection, each zero-padded to d_vp.
    w_kv = jnp.concatenate([jnp.pad(wk, ((0, pad), (0, 0))),
                            jnp.pad(wv, ((0, pad), (0, 0)))], axis=0)      # (2*d_vp, D)
    b_kv = jnp.concatenate([jnp.pad(bk, ((0, pad),)),
                            jnp.pad(bv, ((0, pad),))], axis=0)             # (2*d_vp,)

    # Output projection consumes the padded context (zero input-columns where the pad sits).
    wo_p = jnp.pad(wo.reshape(D, H, d_v), ((0, 0), (0, 0), (0, pad))).reshape(D, H * d_vp)

    w = lambda a: jnp.asarray(a, param_dtype)
    f32 = lambda a: jnp.asarray(a, jnp.float32)
    return {
        "wq_t": w(wq_p.T),  "bq": f32(bq_p).reshape(1, -1),   # (D, H*d_vp), (1, H*d_vp)
        "wkv_t": w(w_kv.T), "bkv": f32(b_kv).reshape(1, -1),  # (D, 2*d_vp), (1, 2*d_vp)
        "wo_t": w(wo_p.T),  "bo": f32(bo).reshape(1, -1),     # (H*d_vp, D), (1, D)
        "head_num": H, "d_v": d_v, "d_vp": d_vp, "d_model": D,
    }


# ------------------------ tiled linear: y = x @ Wt + b ------------------------

def _linear_kernel(x_ref, w_ref, b_ref, o_ref, acc_ref):
    # x: (tm, tk), w: (tk, tn) pre-transposed, b: (1, tn) f32, o: (tm, tn)
    @pl.when(pl.program_id(2) == 0)
    def _():
        acc_ref[...] = jnp.zeros_like(acc_ref)

    acc_ref[...] += jnp.dot(x_ref[...], w_ref[...], preferred_element_type=jnp.float32)

    @pl.when(pl.program_id(2) == pl.num_programs(2) - 1)
    def _():
        o_ref[...] = (acc_ref[...] + b_ref[...]).astype(o_ref.dtype)


def linear(x2d, wt, b, *, out_dtype=None, tm=512, tn=256, tk=512):
    """Tiled, pipelined MXU matmul.  wt is (Din, Dout) (pre-transposed), b is (1, Dout) f32."""
    m, k_dim = x2d.shape
    k2, dout = wt.shape
    assert k_dim == k2
    out_dtype = x2d.dtype if out_dtype is None else out_dtype

    tm = _pick_tile(m, tm, 8)
    tn = _pick_tile(dout, tn, 128)
    tk = _pick_tile(k_dim, tk, 128)

    return pl.pallas_call(
        _linear_kernel,
        out_shape=jax.ShapeDtypeStruct((m, dout), out_dtype),
        grid_spec=pltpu.PrefetchScalarGridSpec(
            num_scalar_prefetch=0,
            grid=(m // tm, dout // tn, k_dim // tk),       # reduction axis last
            in_specs=[
                pl.BlockSpec((tm, tk), lambda i, j, kk: (i, kk)),
                pl.BlockSpec((tk, tn), lambda i, j, kk: (kk, j)),
                pl.BlockSpec((1, tn), lambda i, j, kk: (0, j)),
            ],
            out_specs=pl.BlockSpec((tm, tn), lambda i, j, kk: (i, j)),
            scratch_shapes=[pltpu.VMEM((tm, tn), jnp.float32)],
        ),
        compiler_params=pltpu.CompilerParams(
            dimension_semantics=("parallel", "parallel", "arbitrary")),
    )(x2d, wt, b)


# ------------- flash-style attention over the shared (un-replicated) K/V -------------

def _flash_attn_kernel(q_ref, kv_ref, o_ref, m_sc, l_sc, acc_sc, *, d_vp, approx_recip):
    # q: (1, tq, d_vp); kv: (1, tk, 2*d_vp) packed [K | V]; o: (1, tq, d_vp)
    kv_step = pl.program_id(2)

    @pl.when(kv_step == 0)
    def _():
        m_sc[...] = jnp.full_like(m_sc, -jnp.inf)
        l_sc[...] = jnp.zeros_like(l_sc)
        acc_sc[...] = jnp.zeros_like(acc_sc)

    q = q_ref[0]                         # scale already folded into the Q weights
    kv = kv_ref[0]                       # single DMA'd block; 128-aligned static windows:
    k = kv[:, :d_vp]
    v = kv[:, d_vp:]

    s = lax.dot_general(q, k, (((1,), (1,)), ((), ())),
                        preferred_element_type=jnp.float32)          # (tq, tk)

    m_prev = m_sc[...]
    m_new = jnp.maximum(m_prev, jnp.max(s, axis=-1, keepdims=True))
    alpha = jnp.exp(m_prev - m_new)
    p = jnp.exp(s - m_new)
    l_sc[...] = alpha * l_sc[...] + jnp.sum(p, axis=-1, keepdims=True)
    acc_sc[...] = alpha * acc_sc[...] + jnp.dot(p.astype(v.dtype), v,
                                                preferred_element_type=jnp.float32)
    m_sc[...] = m_new

    @pl.when(kv_step == pl.num_programs(2) - 1)
    def _():
        inv_l = pl.reciprocal(l_sc[...], approx=approx_recip)
        o_ref[0] = (acc_sc[...] * inv_l).astype(o_ref.dtype)


def flash_attention(q2, kv3, *, d_vp, tq=512, tk=1024, approx_recip=False,
                    kv_vmem_budget_bytes=16 * 2**20):
    """q2: (B, H*S, d_vp); kv3: (B, S, 2*d_vp) packed [K | V]  ->  (B, H*S, d_vp).

    Set kv_vmem_budget_bytes per generation (v7x has half the VMEM of v5e/v6e)."""
    B, HS, dq = q2.shape
    assert dq == d_vp
    S = kv3.shape[1]
    itemsize = kv3.dtype.itemsize

    # Keep K|V resident across q-tiles when the (double-buffered) block fits the budget: the kv
    # grid axis then has extent 1 and its block index is constant across q-tiles, so Pallas
    # skips the re-DMA.  Otherwise tile the kv axis and rely on a large tq to cut re-reads.
    if 2 * (S * 2 * d_vp * itemsize) <= kv_vmem_budget_bytes:
        tk = S
    else:
        tk = _pick_tile(S, tk, 8)
    tq = _pick_tile(HS, tq, 8)

    est = (2 * tq * d_vp * q2.dtype.itemsize      # Q double-buffer
           + 2 * tk * 2 * d_vp * itemsize         # K|V double-buffer
           + 2 * tq * d_vp * q2.dtype.itemsize    # O double-buffer
           + tq * d_vp * 4 + 2 * tq * 4)          # f32 scratch
    vmem_limit = int(min(64 << 20, max(32 << 20, 2 * est)))

    kern = functools.partial(_flash_attn_kernel, d_vp=d_vp, approx_recip=approx_recip)
    return pl.pallas_call(
        kern,
        out_shape=jax.ShapeDtypeStruct((B, HS, d_vp), q2.dtype),
        grid_spec=pltpu.PrefetchScalarGridSpec(
            num_scalar_prefetch=0,
            grid=(B, HS // tq, S // tk),
            in_specs=[
                pl.BlockSpec((1, tq, d_vp), lambda b, i, j: (b, i, 0)),
                pl.BlockSpec((1, tk, 2 * d_vp), lambda b, i, j: (b, j, 0)),
            ],
            out_specs=pl.BlockSpec((1, tq, d_vp), lambda b, i, j: (b, i, 0)),
            scratch_shapes=[
                pltpu.VMEM((tq, 1), jnp.float32),     # running max
                pltpu.VMEM((tq, 1), jnp.float32),     # running sum
                pltpu.VMEM((tq, d_vp), jnp.float32),  # output accumulator
            ],
        ),
        # B and the q-tile axis are "parallel": sharded across v7x's 2 TensorCores (no-op on
        # v5e/v6e single-core chips); the kv axis carries the online-softmax state -> arbitrary.
        compiler_params=pltpu.CompilerParams(
            dimension_semantics=("parallel", "parallel", "arbitrary"),
            vmem_limit_bytes=vmem_limit),
    )(q2, kv3)


# ------------------------------- full forward pass -------------------------------

def multi_query_attention(x, pp, *, approx_recip=None):
    """x: (B, S, d_model); pp: output of prepare_params()."""
    B, S, D = x.shape
    H, d_vp = pp["head_num"], pp["d_vp"]
    HS = H * S

    act_dtype = pp["wq_t"].dtype          # projections emit activations in the weight dtype
    x2d = x.reshape(B * S, D)
    if x2d.dtype != act_dtype:
        x2d = x2d.astype(act_dtype)       # one small cast; prod callers already hold bf16 acts

    # Two tiled projections (Q and fused K|V) -> no XLA slice passes over the activations.
    q = linear(x2d, pp["wq_t"], pp["bq"], out_dtype=act_dtype)      # (B*S, H*d_vp)
    kv = linear(x2d, pp["wkv_t"], pp["bkv"], out_dtype=act_dtype)   # (B*S, 2*d_vp)

    # Free row-major reshapes (no data movement).  query.view(B, H, S, d_v) flattened is exactly
    # the d_v-chunk (here d_vp-chunk, zero-padded) enumeration of the Q buffer; every chunk
    # attends over the same shared K/V (the torch.cat replication cancels in softmax).
    q2 = q.reshape(B, HS, d_vp)
    kv3 = kv.reshape(B, S, 2 * d_vp)

    if approx_recip is None:
        approx_recip = act_dtype != jnp.float32
    ctx = flash_attention(q2, kv3, d_vp=d_vp, approx_recip=approx_recip)  # (B, HS, d_vp)

    # x.view(batch, -1, head_num * d_v): same flat ordering; the padded columns are exactly zero
    # and line up with zero input-columns of the padded output projection.
    ctx2d = ctx.reshape(B * S, H * d_vp)
    out = linear(ctx2d, pp["wo_t"], pp["bo"], out_dtype=x.dtype)
    return out.reshape(B, S, D)


# ---------------- pure-JAX reference, faithful to the torch module ----------------

def ref_forward(x, params, head_num):
    B, S, D = x.shape
    d_v = D // head_num
    q = x @ params["wq"].T + params["bq"]
    k = x @ params["wk"].T + params["bk"]
    v = x @ params["wv"].T + params["bv"]
    q4 = q.reshape(B, head_num, S, d_v)
    k_cat = jnp.concatenate([k] * head_num, axis=1)           # (B, H*S, d_v)
    v_cat = jnp.concatenate([v] * head_num, axis=1)
    scores = jnp.einsum("bhsd,btd->bhst", q4, k_cat) / math.sqrt(d_v)
    p = jax.nn.softmax(scores, axis=-1)
    ctx = jnp.einsum("bhst,btd->bhsd", p, v_cat).reshape(B, S, D)
    return ctx @ params["wo"].T + params["bo"]


if __name__ == "__main__":
    B, S, d_model, head_num = 2, 8, 32, 4
    d_v = d_model // head_num

    key = jax.random.PRNGKey(0)
    ks = jax.random.split(key, 9)
    init = lambda kk, shape: (jax.random.normal(kk, shape, jnp.float32) * 0.05)
    params = {
        "wq": init(ks[0], (d_model, d_model)), "bq": init(ks[1], (d_model,)),
        "wk": init(ks[2], (d_v, d_model)),     "bk": init(ks[3], (d_v,)),
        "wv": init(ks[4], (d_v, d_model)),     "bv": init(ks[5], (d_v,)),
        "wo": init(ks[6], (d_model, d_model)), "bo": init(ks[7], (d_model,)),
    }
    x = jax.random.normal(ks[8], (B, S, d_model), jnp.float32)

    ref = ref_forward(x, params, head_num)

    # Exact-f32 path for the tight correctness check.
    pp32 = prepare_params(params, head_num, param_dtype=jnp.float32)
    out = jax.block_until_ready(multi_query_attention(x, pp32, approx_recip=False))
    assert out.shape == (B, S, d_model)
    assert jnp.allclose(out, ref, atol=1e-4, rtol=1e-4), "f32 mismatch vs JAX reference"

    # Production path: bf16 weights/activations (native MXU rate, half the DMA bytes),
    # approximate reciprocal in the epilogue.  Looser tolerance for bf16 rounding.
    pp_bf16 = prepare_params(params, head_num, param_dtype=jnp.bfloat16)
    out_bf16 = jax.block_until_ready(multi_query_attention(x, pp_bf16))
    assert out_bf16.shape == (B, S, d_model)
    assert jnp.allclose(out_bf16, ref, atol=5e-2, rtol=5e-2), "bf16 mismatch vs JAX reference"

    print("KERNEL_OK")
</pallas_src>

<mosaic_0001>
module attributes {stable_mosaic.version = 11 : i64} {
  func.func @_linear_kernel(%arg0: i32, %arg1: i32, %arg2: i32, %arg3: memref<16x32xf32, #tpu.memory_space<vmem>>, %arg4: memref<32x256xf32, #tpu.memory_space<vmem>>, %arg5: memref<1x256xf32, #tpu.memory_space<vmem>>, %arg6: memref<16x256xf32, #tpu.memory_space<vmem>>, %arg7: memref<16x256xf32, #tpu.memory_space<vmem>>) attributes {dimension_semantics = [#tpu.dimension_semantics<parallel>, #tpu.dimension_semantics<parallel>, #tpu.dimension_semantics<arbitrary>], iteration_bounds = array<i64: 1, 2, 1>, scalar_prefetch = 0 : i64, scratch_operands = 1 : i64, tpu.core_type = #tpu.core_type<tc>, window_params = [{transform_indices = @transform_0, window_bounds = array<i64: 16, 32>}, {transform_indices = @transform_1, window_bounds = array<i64: 32, 256>}, {transform_indices = @transform_2, window_bounds = array<i64: 1, 256>}, {transform_indices = @transform_3, window_bounds = array<i64: 16, 256>}]} {
    %c0_i32 = arith.constant 0 : i32
    %0 = arith.cmpi eq, %arg2, %c0_i32 : i32
    %1 = arith.extui %0 : i1 to i32
    %c0_i32_0 = arith.constant 0 : i32
    %2 = arith.cmpi ne, %1, %c0_i32_0 : i32
    scf.if %2 {
      %cst_10 = arith.constant 0.000000e+00 : f32
      %12 = vector.broadcast %cst_10 : f32 to vector<16x256xf32>
      %c0_11 = arith.constant 0 : index
      %c0_12 = arith.constant 0 : index
      %13 = vector.load %arg7[%c0_11, %c0_12] : memref<16x256xf32, #tpu.memory_space<vmem>>, vector<16x256xf32>
      tpu.vector_store %arg7[%c0_11, %c0_12], %12 {strides = array<i32>} : memref<16x256xf32, #tpu.memory_space<vmem>>, vector<16x256xf32>,
    } else {
    }
    %c0 = arith.constant 0 : index
    %c0_1 = arith.constant 0 : index
    %3 = vector.load %arg7[%c0, %c0_1] : memref<16x256xf32, #tpu.memory_space<vmem>>, vector<16x256xf32>
    %c0_2 = arith.constant 0 : index
    %c0_3 = arith.constant 0 : index
    %4 = vector.load %arg3[%c0_2, %c0_3] : memref<16x32xf32, #tpu.memory_space<vmem>>, vector<16x32xf32>
    %c0_4 = arith.constant 0 : index
    %c0_5 = arith.constant 0 : index
    %5 = vector.load %arg4[%c0_4, %c0_5] : memref<32x256xf32, #tpu.memory_space<vmem>>, vector<32x256xf32>
    %cst = arith.constant dense<0.000000e+00> : vector<16x256xf32>
    %6 = tpu.matmul %4, %5, %cst {dimension_numbers = #tpu.dot_dimension_numbers<[1], [0], [0], [1], [0, 0, 1, 1], [], []>} : vector<16x32xf32>, vector<32x256xf32>, vector<16x256xf32> -> vector<16x256xf32>
    %7 = arith.addf %3, %6 : vector<16x256xf32>
    %c0_6 = arith.constant 0 : index
    %c0_7 = arith.constant 0 : index
    %8 = vector.load %arg7[%c0_6, %c0_7] : memref<16x256xf32, #tpu.memory_space<vmem>>, vector<16x256xf32>
    tpu.vector_store %arg7[%c0_6, %c0_7], %7 {strides = array<i32>} : memref<16x256xf32, #tpu.memory_space<vmem>>, vector<16x256xf32>,
    %c0_i32_8 = arith.constant 0 : i32
    %9 = arith.cmpi eq, %arg2, %c0_i32_8 : i32
    %10 = arith.extui %9 : i1 to i32
    %c0_i32_9 = arith.constant 0 : i32
    %11 = arith.cmpi ne, %10, %c0_i32_9 : i32
    scf.if %11 {
      %c0_10 = arith.constant 0 : index
      %c0_11 = arith.constant 0 : index
      %12 = vector.load %arg7[%c0_10, %c0_11] : memref<16x256xf32, #tpu.memory_space<vmem>>, vector<16x256xf32>
      %c0_12 = arith.constant 0 : index
      %c0_13 = arith.constant 0 : index
      %13 = vector.load %arg5[%c0_12, %c0_13] : memref<1x256xf32, #tpu.memory_space<vmem>>, vector<1x256xf32>
      %14 = vector.broadcast %13 : vector<1x256xf32> to vector<16x256xf32>
      %15 = arith.addf %12, %14 : vector<16x256xf32>
      %c0_14 = arith.constant 0 : index
      %c0_15 = arith.constant 0 : index
      %16 = vector.load %arg6[%c0_14, %c0_15] : memref<16x256xf32, #tpu.memory_space<vmem>>, vector<16x256xf32>
      tpu.vector_store %arg6[%c0_14, %c0_15], %15 {strides = array<i32>} : memref<16x256xf32, #tpu.memory_space<vmem>>, vector<16x256xf32>,
    } else {
    }
    return
  }
  func.func @transform_0(%arg0: i32, %arg1: i32, %arg2: i32) -> (i32, i32) {
    %c0_i32 = arith.constant 0 : i32
    return %arg0, %arg2 : i32, i32
  }
  func.func @transform_1(%arg0: i32, %arg1: i32, %arg2: i32) -> (i32, i32) {
    %c0_i32 = arith.constant 0 : i32
    return %arg2, %arg1 : i32, i32
  }
  func.func @transform_2(%arg0: i32, %arg1: i32, %arg2: i32) -> (i32, i32) {
    %c0_i32 = arith.constant 0 : i32
    %c0_i32_0 = arith.constant 0 : i32
    return %c0_i32, %arg1 : i32, i32
  }
  func.func @transform_3(%arg0: i32, %arg1: i32, %arg2: i32) -> (i32, i32) {
    %c0_i32 = arith.constant 0 : i32
    return %arg0, %arg1 : i32, i32
  }
}

</mosaic_0001>

<bundles_post_ra>
// kernel: tpu_custom_call.1
= control target key start
LH: loop header
LB: loop body
LE: loop exit
PB: predicated region body
PF: predicated region fallthrough
CT: control target
= control target key end

     0   :  { %8 = vsyncpa [#allocation4], 0  ;;  %s1057_s0 = inlined_call_operand.hbm [shape: f32[16,32], index: 0, kind: input, shape index: {}]   ;;  %s1058_s1 = inlined_call_operand.hbm [shape: f32[32,512], index: 1, kind: input, shape index: {}]   ;;  %s1059_s2 = inlined_call_operand.vmem [shape: f32[1,512], index: 2, kind: input, shape index: {}]   ;;  %s1060_s3 = inlined_call_operand.hbm [shape: f32[16,512], index: 3, kind: output, shape index: {}]  }
   0x1   :  { %9 = vsyncpa [#allocation7], 0 }
   0x2   :  { %11 = vsyncpa [#allocation7 + $0x1], 0 }
   0x3   :  { %12 = vsyncpa [#allocation5], 0 }
   0x4   :  { %14 = vsyncpa [#allocation5 + $0x1], 0  ;;  %s832_s12 = smov 0   ;;  %s834_s13 = smov 0  }
   0x5   :  { %s836_s14 = smov 0   ;;  %s838_s15 = smov 0  }
   0x6   :  { %s840_s16 = smov 0   ;;  %s842_s17 = smov 0  }
   0x7 LB: > { %s538_s18 = sadd.s32 4294967295, %s798_s17   ;;  %s539_s19 = sadd.s32 4294967294, %s798_s17   ;;  %s798_s17 = sphi %s842_s17, %s20_s17   ;;  %s794_s16 = sphi %s840_s16, %s1086_s16   ;;  %s790_s15 = sphi %s838_s15, %s1085_s15   ;;  %s786_s14 = sphi %s836_s14, %s1084_s14   ;;  %s782_s13 = sphi %s834_s13, %s1083_s13   ;;  %s778_s12 = sphi %s832_s12, %s1082_s12  }
   0x8   : > { %p83_p0 = scmp.ne.s32.totalorder %s786_s14, %s782_s13  ;;  %p84_p1 = scmp.eq.s32.totalorder %s798_s17, 0 }
   0x9   : > { %p89_p2 = scmp.ne.s32.totalorder %s782_s13, %s778_s12  ;;  %p869_p3 = scmp.eq.s32.totalorder %s538_s18, 0 }
   0xa   : > { %p873_p4 = por %p84_p1, %p83_p0  ;;  %p141_p5 = scmp.eq.s32.totalorder %s538_s18, 1 }
   0xb   : > { %s1067_s20 = scalar_select %p869_p3, 1, 0 }
   0xc   : > { %p879_p6 = por %p869_p3, %p89_p2  ;;  %p147_p7 = scmp.eq.s32.totalorder %s539_s19, 1 }
   0xd   : > { %p883_p8 = por %p141_p5, %p83_p0  ;;  %p540_p9 = scmp.ge.s32.totalorder %s798_s17, 1 }
   0xe   : > { %s1069_s22 = scalar_select %p879_p6, 1, 0 }
   0xf   : > { %s1070_s23 = scalar_select %p883_p8, 1, 0 }
  0x10   : > { %p888_p10 = por %p147_p7, %p89_p2  ;;  %p154_p11 = scmp.lt.s32.totalorder %s798_s17, 3 }
  0x11   : > { %s800_s26 = smov [#allocation3]   ;;  %p593_p1 = scmp.lt.s32.totalorder %s798_s17, 2 }
  0x12   : > { %s1071_s24 = scalar_select %p888_p10, 1, 0 }
  0x13   : > { %p893_p12 = pnand %p540_p9, %p154_p11  ;;  %s170_s27 = sshll.u32 %s800_s26, 4  ;;  %s897_s27 = int_to_ptr.vmem [resolvable:$true] %s170_s27 }
  0x14   : > { %p911_p2 = pnand %p593_p1, %p873_p4  ;;  %s35_s30 = sadd.s32 1, %s794_s16 }
  0x15   : > { %s1072_s25 = scalar_select %p893_p12, 1, 0 }
  0x16   : > { %p580_p13 = pneg %p893_p12  ;;  %s654_s6 = scalar_lea.hbm %s1057_s0, 256 }
  0x17   : > { %s1074_s29 = scalar_select %p911_p2, 1, 0 }
  0x18   : > { %p905_p5 = pnand %p580_p13, %p869_p3  ;;  %p655_p7 = scmp.ne.s32.totalorder %s1057_s0, %s654_s6 }
  0x19   : > { %p661_p4 = scmp.lt.u32.totalorder %s654_s6, %s1057_s0 }
  0x1a   : > { %p656_p9 = pneg %p905_p5 }
  0x1c   : > { %p657_p11 = pnand %p656_p9, %p655_p7 }
  0x1e   : > { %p658_p13 = pneg %p657_p11 }
  0x20   : > { %p663_p1 = pnand %p661_p4, %p658_p13 }
  0x22   : > { %666 = shalt.err (!%p663_p1)
}
  0x23   : > { %s667_s11 = scalar_lea.vmem %s897_s27, 256  ;;  %p675_p6 = scmp.lt.s32.totalorder %s897_s27, %s897_s27 }
  0x24   : > { %p668_p0 = scmp.ne.s32.totalorder %s897_s27, %s667_s11  ;;  %p676_p3 = scmp.lt.s32.totalorder %s667_s11, %s667_s11 }
  0x26   : > { %p670_p10 = pnand %p668_p0, %p656_p9  ;;  %p677_p12 = por %p676_p3, %p675_p6 }
  0x28   : > { %p671_p8 = pneg %p670_p10 }
  0x2a   : > { %p678_p2 = pnand %p677_p12, %p671_p8 }
  0x2c   : > { %681 = shalt.err (!%p678_p2)
}
  0x2d   : > { %s801_s18 = smov 128   ;;  %s802_s19 = smov 8  }
  0x2e   : > { %583 = dma.hbm_to_vmem [thread:$0]  (!%p905_p5), %s1057_s0, 256, %s897_s27, [#allocation4], %s801_s18, %s801_s18, %s802_s19  }
  0x2f   : > { %p37_p10 = scmp.ge.s32.totalorder %s35_s30, 2  ;;  %s76_s4 = sadd.s32 1, %s786_s14 }
  0x30   : > { %s184_s5 = sand.u32 1, %s786_s14   ;;  %s558_s8 = sshll.u32 %s794_s16, 8 }
  0x31   : > { %s1088_s30 = smov (%p37_p10, %s35_s30), 0  ;;  %s543_s6 = sshll.u32 %s184_s5, 6 }
  0x32   : > { %s72_s7 = ssub.s32 %s794_s16, %s1088_s30  ;;  %s947_s28 = scalar_lea.hbm %s1058_s1, %s558_s8 }
  0x33   : > { %p74_p3 = scmp.eq.s32.totalorder %s72_s7, 0  ;;  %s188_s27 = scalar_lea.vmem [#allocation6], %s543_s6 }
  0x34   : > { %s198_s11 = sshll.u32 %s188_s27, 4  ;;  %s954_s19 = scalar_lea.sflag [#allocation7], %s184_s5  ;;  %s952_s11 = int_to_ptr.vmem [resolvable:$true] %s198_s11 }
  0x35   : > { %s950_s18 = scalar_select %p74_p3, %s786_s14, %s76_s4  }
  0x36   : > { %s682_s21 = scalar_lea.hbm %s947_s28, 1024  ;;  %p1075_p8 = scmp.ne.s32.totalorder %s1074_s29, 0 }
  0x37   : > { %p683_p6 = scmp.ne.s32.totalorder %s947_s28, %s682_s21  ;;  %s687_s8 = scalar_lea.hbm %s1058_s1, 2048 }
  0x38   : > { %p684_p12 = pneg %p1075_p8  ;;  %p688_p2 = scmp.lt.u32.totalorder %s947_s28, %s1058_s1 }
  0x39   : > { %p689_p7 = scmp.lt.u32.totalorder %s687_s8, %s682_s21  ;;  %p691_p11 = scmp.lt.u32.totalorder %s682_s21, %s947_s28 }
  0x3a   : > { %p685_p0 = pnand %p684_p12, %p683_p6 }
  0x3b   : > { %p690_p9 = por %p689_p7, %p688_p2 }
  0x3c   : > { %p686_p5 = pneg %p685_p0 }
  0x3d   : > { %p692_p13 = por %p691_p11, %p690_p9 }
  0x3f   : > { %p693_p4 = pnand %p692_p13, %p686_p5 }
  0x41   : > { %696 = shalt.err (!%p693_p4)
}
  0x42   : > { %s697_s4 = scalar_lea.vmem %s952_s11, 1024  ;;  %s803_s5 = smov [#allocation6]  }
  0x43   : > { %p698_p1 = scmp.ne.s32.totalorder %s952_s11, %s697_s4  ;;  %s702_s10 = sshll.u32 %s803_s5, 4  ;;  %s703_s10 = int_to_ptr.vmem [resolvable:$false] %s702_s10 }
  0x44   : > { %s704_s27 = scalar_lea.vmem %s703_s10, 2048  ;;  %p705_p6 = scmp.lt.s32.totalorder %s952_s11, %s703_s10 }
  0x45   : > { %p700_p10 = pnand %p698_p1, %p684_p12  ;;  %p706_p0 = scmp.lt.s32.totalorder %s704_s27, %s697_s4 }
  0x47   : > { %p701_p3 = pneg %p700_p10  ;;  %p707_p2 = por %p706_p0, %p705_p6 }
  0x49   : > { %p708_p7 = pnand %p707_p2, %p701_p3 }
  0x4b   : > { %711 = shalt.err (!%p708_p7)
}
  0x4c   : > { %s804_s21 = smov 512   ;;  %s805_s26 = smov 256  }
  0x4d   : > { %s806_s7 = smov 16   ;;  %p1076_p12 = scmp.ne.s32.totalorder %s1072_s25, 0 }
  0x4e   : > { %587 = dma.hbm_to_vmem [thread:$0]  (!%p1075_p8), %s947_s28, 1024, %s952_s11, %s954_s19, %s804_s21, %s805_s26, %s806_s7  }
  0x4f   : > { %218 = sbr.rel (%p1076_p12) target bundleno = 333 (0x14d), region = 32  ;;  %p1077_p5 = scmp.ne.s32.totalorder (!%p1076_p12), %s1067_s20, 0 }
  0x56   : > { %765 = dma.done.wait (%p1077_p5), [#allocation4], 256  }
  0x57   : > { %767 = vsyncadd (%p1077_p5), [#allocation4], 4294967040  ;;  %s989_s8 = sand.u32 1, %s782_s13   ;;  %p1078_p9 = scmp.ne.s32.totalorder %s1069_s22, 0 }
  0x58   : > { %s548_s6 = sshll.u32 %s989_s8, 6  ;;  %s225_s9 = scalar_lea.sflag [#allocation7], %s989_s8 }
  0x59   : > { %s228_s4 = scalar_lea.vmem [#allocation6], %s548_s6 }
  0x5a   : > { %769 = dma.done.wait (%p1078_p9), %s225_s9, 1024  }
  0x5b   : > { %771 = vsyncadd (%p1078_p9), %s225_s9, 4294966272  ;;  %v807_v0 = vmov 0.0   ;;  %v280_v1 = vld [vmem:[%s228_s4 + $0x8] sm:$0xff]  ;;  %v282_v2 = vld [vmem:[%s228_s4 + $0x18] sm:$0xff]  ;;  %vm287_vm0 = vcmask 261120   ;;  %s550_s20 = sshll.u32 %s790_s15, 1  ;;  %v388_v15 = vlaneseq }
  0x5c   : > { %358 = vmatprep.mubr.f32.mxu0 %v807_v0  ;;  %364 = vmatprep.mubr.f32.mxu1 %v807_v0  ;;  %v279_v3 = vld [vmem:[%s228_s4] sm:$0xff]  ;;  %v560_v4 = vpack.c.bf16 %v282_v2, %v280_v1  ;;  %v281_v5 = vld [vmem:[%s228_s4 + $0x10] sm:$0xff]  ;;  %v284_v6 = vld [vmem:[%s228_s4 + $0x28] sm:$0xff]  ;;  %p259_p8 = scmp.lt.s32.totalorder %s550_s20, 3  ;;  %s549_s22 = sshll.u32 %s989_s8, 5 }
  0x5d   : > { %v286_v7 = vld [vmem:[%s228_s4 + $0x38] sm:$0xff]  ;;  %v562_v8 = vpack.c.bf16 %v281_v5, %v279_v3  ;;  %v283_v10 = vld [vmem:[%s228_s4 + $0x20] sm:$0xff]  ;;  %v285_v11 = vld [vmem:[%s228_s4 + $0x30] sm:$0xff]  ;;  %v389_v16 = vshrl.u32 %v388_v15, 7  ;;  %s254_s11 = scalar_lea.vmem [#allocation8], %s549_s22  ;;  %s559_s5 = sshll.u32 %s790_s15, 8 }
  0x5e   : > { %v564_v9 = vpack.c.bf16 %v286_v7, %v284_v6  ;;  %561 = vmatprep.subr.bf16.mxu0 %v560_v4  ;;  %568 = vmatprep.subr.bf16.mxu1 %v560_v4  ;;  %v566_v12 = vpack.c.bf16 %v285_v11, %v283_v10  ;;  %v277_v13 = vld [vmem:[#allocation3] sm:$0xff]  ;;  %v278_v14 = vld [vmem:[#allocation3 + $0x8] sm:$0xff]  ;;  %s1090_s20 = smov (!%p259_p8, %s550_s20), 3  ;;  %s423_s19 = sshll.u32 %s254_s11, 4  ;;  %s1003_s19 = int_to_ptr.vmem [resolvable:$true] %s423_s19 }
  0x5f   : > { %563 = vmatpush1.bf16.msra.mxu0 %v562_v8  ;;  %570 = vmatpush1.bf16.msra.mxu1 %v562_v8  ;;  %s261_s28 = scalar_lea.vmem %s1059_s2, %s1090_s20  ;;  %v390_v17 = vsub.s32 0, %v389_v16  ;;  %v394_v19 = vsub.s32 1, %v389_v16  ;;  %s1008_s21 = scalar_lea.hbm %s1060_s3, %s559_s5 }
  0x60   : > { %565 = vmatprep.subr.bf16.mxu0 %v564_v9  ;;  %569 = vmatprep.subr.bf16.mxu1 %v564_v9  ;;  %v386_v18 = vld [vmem:[%s261_s28] sm:$0x3]  ;;  %s407_s15 = scalar_lea.sflag [#allocation5], %s989_s8  ;;  %s712_s26 = scalar_lea.vmem %s1003_s19, 512 }
  0x61   : > { %v391_v20 = vrot.slane %v386_v18, %v390_v17  ;;  %v395_v21 = vrot.slane %v386_v18, %v394_v19  ;;  %p713_p11 = scmp.ne.s32.totalorder %s1003_s19, %s712_s26  ;;  %p1079_p13 = scmp.ne.s32.totalorder %s1070_s23, 0 }
  0x62   : > { %s808_s7 = smov [#allocation8]  }
  0x63   : > { %567 = vmatpush1.bf16.msra.mxu0 %v566_v12  ;;  %571 = vmatpush1.bf16.msra.mxu1 %v566_v12  ;;  %p714_p4 = pnand %p713_p11, %p1079_p13  ;;  %s716_s6 = sshll.u32 %s808_s7, 4  ;;  %s717_s6 = int_to_ptr.vmem [resolvable:$false] %s716_s6 }
  0x64   : > { %s718_s9 = scalar_lea.vmem %s717_s6, 1024  ;;  %p719_p10 = scmp.lt.s32.totalorder %s1003_s19, %s717_s6 }
  0x65   : > { %p715_p1 = pneg %p714_p4  ;;  %p720_p3 = scmp.lt.s32.totalorder %s718_s9, %s712_s26 }
  0x66   : > { %551 = vmatmul.mubr.msk.f32.vlgmr.msra.gmra.mrb[0].mxu0 %vm287_vm0, %v277_v13  ;;  %552 = vmatmul.mubr.msk.f32.vlgmr.msra.gmra.mrb[0].mxu1 %vm287_vm0, %v278_v14 }
  0x67   : > { %p721_p6 = por %p720_p3, %p719_p10 }
  0x69   : > { %p722_p0 = pnand %p721_p6, %p715_p1 }
 0x139   : > { %v360_v22 = vpop.f32.mrb[0].mxu0  ;;  %v366_v23 = vpop.f32.mrb[0].mxu1 }
 0x13a   : > { %v398_v24 = vadd.f32 %v391_v20, %v360_v22  ;;  %v400_v25 = vadd.f32 %v391_v20, %v366_v23  ;;  %v362_v26 = vpop.f32.mrb[1].mxu0  ;;  %v368_v27 = vpop.f32.mrb[1].mxu1 }
 0x13b   : > { %v399_v28 = vadd.f32 %v395_v21, %v362_v26  ;;  %v401_v29 = vadd.f32 %v395_v21, %v368_v27 }
 0x13c   : > { %402 = vst [vmem:[%s254_s11] sm:$0xff] %v398_v24  ;;  %404 = vst [vmem:[%s254_s11 + $0x10] sm:$0xff] %v400_v25 }
 0x13d   : > { %403 = vst [vmem:[%s254_s11 + $0x8] sm:$0xff] %v399_v28  ;;  %405 = vst [vmem:[%s254_s11 + $0x18] sm:$0xff] %v401_v29 }
 0x13e   : > { %725 = shalt.err (!%p722_p0)
}
 0x13f   : > { %s726_s4 = scalar_lea.hbm %s1008_s21, 512  ;;  %s730_s25 = scalar_lea.hbm %s1060_s3, 1024 }
 0x140   : > { %p727_p2 = scmp.ne.s32.totalorder %s1008_s21, %s726_s4  ;;  %p731_p5 = scmp.lt.u32.totalorder %s1008_s21, %s1060_s3 }
 0x141   : > { %p732_p9 = scmp.lt.u32.totalorder %s730_s25, %s726_s4  ;;  %p734_p11 = scmp.lt.u32.totalorder %s726_s4, %s1008_s21 }
 0x142   : > { %p728_p7 = pnand %p727_p2, %p1079_p13 }
 0x143   : > { %p733_p8 = por %p732_p9, %p731_p5 }
 0x144   : > { %p729_p12 = pneg %p728_p7 }
 0x145   : > { %p735_p4 = por %p734_p11, %p733_p8 }
 0x147   : > { %p736_p1 = pnand %p735_p4, %p729_p12 }
 0x149   : > { %739 = shalt.err (!%p736_p1)
}
 0x14a   : > { %s809_s11 = smov 256   ;;  %s810_s5 = smov 512  }
 0x14b   : > { %s811_s10 = smov 16  }
 0x14c   : > { %578 = dma.vmem_to_hbm [thread:$0]  (%p1079_p13), %s1003_s19, 512, %s1008_s21, %s407_s15, %s809_s11, %s810_s5, %s811_s10  }
 0x14d PF: > { %s438_s27 = sand.u32 1, %s778_s12   ;;  %p1080_p10 = scmp.ne.s32.totalorder %s1071_s24, 0 }
 0x14e   : > { %p1081_p3 = scmp.ge.s32.totalorder %s798_s17, 2  ;;  %s439_s26 = scalar_lea.sflag [#allocation5], %s438_s27 }
 0x150   : > { %p589_p6 = pnand %p1081_p3, %p1080_p10 }
 0x152   : > { %773 = dma.done.wait (!%p589_p6), %s439_s26, 512  }
 0x153   : > { %775 = vsyncadd (!%p589_p6), %s439_s26, 4294966784  ;;  %s20_s17 = sadd.s32 1, %s798_s17   ;;  %s1082_s12 = smov %s782_s13 }
 0x154   : > { %p17_p0 = scmp.ge.s32.totalorder %s20_s17, 4   ;;  %s1083_s13 = smov %s786_s14 }
 0x155   : > { %s1084_s14 = smov %s950_s18  ;;  %s1085_s15 = smov %s794_s16 }
 0x156   : > { %s1086_s16 = smov %s1088_s30  ;;  %19 = sbr.rel (!%p17_p0) target bundleno = 7 (0x7), region = 94 }
 0x15d   :  { %444 = vsyncpa [#allocation4], 1 }
 0x15e   :  { %446 = vsyncpa [#allocation4 + $0x1], 1 }
 0x15f   :  { %447 = vsyncpa [#allocation7], 1 }
 0x160   :  { %449 = vsyncpa [#allocation7 + $0x1], 1 }
 0x161   :  { %450 = vsyncpa [#allocation5], 1 }
 0x162   :  { %452 = vsyncpa [#allocation5 + $0x1], 1 }

</bundles_post_ra>
